<compile_context>
chip_gen: v7x
topology: tpu7x:2x2x1
jax: 0.10.0
libtpu: 0.0.40
codegen_flags: <defaults>
</compile_context>

<pallas_src>
import functools
import numpy as np
import jax
import jax.numpy as jnp
from jax.experimental import pallas as pl
from jax.experimental.pallas import tpu as pltpu


# ------------------------------------------------------------ kernel helpers --
def _sep_interp(h, uwT, h_taps, Hin, Win, dot_dtype):
    """Separable align_corners bilinear resize of a flat (C, Hin*Win) activation.

    W axis: one small matmul per input row against uwT (Win, Wout) on the MXU.
    H axis: host-unrolled sparse taps (<=2 nonzeros per output row) on the VPU.
    Returns (C, Hout*Wout) f32 with Hout = len(h_taps), Wout = uwT.shape[1].
    """
    wrows = [
        jnp.dot(h[:, b * Win:(b + 1) * Win].astype(dot_dtype), uwT,
                preferred_element_type=jnp.float32)
        for b in range(Hin)
    ]
    out_rows = []
    for taps in h_taps:
        acc = None
        for b, w in taps:
            term = wrows[b] if w == 1.0 else wrows[b] * w
            acc = term if acc is None else acc + term
        out_rows.append(acc)
    return jnp.concatenate(out_rows, axis=1)


def _conv3x3(z, wf, mask_ref, W, HW, dot_dtype):
    """3x3 same-padding conv on a flat (Cin, H*W) activation.

    The 9 taps are lane rotations of z (pltpu.roll -> XLU, no VMEM copies),
    zeroed outside the image by host-precomputed masks, stacked along sublanes
    and contracted in ONE K=9*Cin MXU matmul against wf (Cout, 9*Cin).
    """
    taps = []
    for dy in range(3):
        for dx in range(3):
            t = dy * 3 + dx
            o = (dy - 1) * W + (dx - 1)           # flat spatial offset of tap
            if o == 0:
                zt = z                            # center tap: always valid
            else:
                zt = pltpu.roll(z, (-o) % HW, 1) * mask_ref[t]
            taps.append(zt.astype(dot_dtype))
    stacked = jnp.concatenate(taps, axis=0)       # (9*Cin, HW)
    return jnp.dot(wf, stacked, preferred_element_type=jnp.float32)


# ------------------------------------------------------------------- kernel --
def _expansion_kernel(*refs, Hl, Wl, Hm, Wm, Ws, HWs,
                      h_taps_up, h_taps_rs, has_resize, dot_dtype):
    if has_resize:
        (x_ref, sc_ref, a0_ref, uw_up_ref, uw_rs_ref,
         a1a_ref, a1b_ref, w3a_ref, w3b_ref, bias_ref, mask_ref, o_ref) = refs
    else:
        (x_ref, sc_ref, a0_ref, uw_up_ref,
         a1a_ref, a1b_ref, w3a_ref, w3b_ref, bias_ref, mask_ref, o_ref) = refs
        uw_rs_ref = None

    x = x_ref[0]                       # (Cl,  Hl*Wl)  lowres
    sc = sc_ref[0]                     # (Csc, Hs*Ws)  shortcut
    bias = bias_ref[...]               # (Cout, 4) packed biases
    b0, b1 = bias[:, 0:1], bias[:, 1:2]
    br1, br2 = bias[:, 2:3], bias[:, 3:4]

    # scale0 1x1 conv (bn0 scale folded into the weights)
    h = jnp.dot(a0_ref[...], x.astype(dot_dtype),
                preferred_element_type=jnp.float32)               # (Cout, Hl*Wl)
    # bilinear x`scale` upsample (align_corners), separable
    h = _sep_interp(h, uw_up_ref[...], h_taps_up, Hl, Wl, dot_dtype)  # (Cout, Hm*Wm)
    # bn0 bias + relu
    h = jnp.maximum(h + b0, 0.0)
    # F.interpolate to shortcut size (statically skipped when identity)
    if has_resize:
        h = _sep_interp(h, uw_rs_ref[...], h_taps_rs, Hm, Wm, dot_dtype)

    # conv1 on concat([h, shortcut]) split into two matmuls; bn1 folded, bias+relu
    h = (jnp.dot(a1a_ref[...], h.astype(dot_dtype),
                 preferred_element_type=jnp.float32)
         + jnp.dot(a1b_ref[...], sc.astype(dot_dtype),
                   preferred_element_type=jnp.float32))
    h = jnp.maximum(h + b1, 0.0)                                  # (Cout, Hs*Ws)

    # BasicBlock: conv3x3-bn-relu, conv3x3-bn + identity, relu (bn scales folded)
    y = jnp.maximum(_conv3x3(h, w3a_ref[...], mask_ref, Ws, HWs, dot_dtype) + br1,
                    0.0)
    y = _conv3x3(y, w3b_ref[...], mask_ref, Ws, HWs, dot_dtype) + br2 + h
    o_ref[0] = jnp.maximum(y, 0.0)


# -------------------------------------------------------------- host helpers --
def _bilinear_matrix(out_size, in_size):
    # align_corners=True bilinear interpolation weights (matches F.interpolate)
    # TODO(synk): out_size==1 / in_size==1 fallback puts all weight on index 0.
    W = np.zeros((out_size, in_size), np.float32)
    if out_size == 1 or in_size == 1:
        W[:, 0] = 1.0
        return W
    src = np.arange(out_size, dtype=np.float64) * (in_size - 1) / (out_size - 1)
    i0 = np.clip(np.floor(src).astype(np.int64), 0, in_size - 2)
    frac = (src - i0).astype(np.float32)
    rows = np.arange(out_size)
    W[rows, i0] = 1.0 - frac
    W[rows, i0 + 1] = frac
    return W


def _row_taps(U):
    # host-known sparsity of the H interpolation matrix: per output row, the
    # (input_row, weight) pairs with nonzero weight (<=2 for bilinear).
    taps = []
    for a in range(U.shape[0]):
        nz = np.nonzero(U[a])[0]
        taps.append(tuple((int(b), float(U[a, b])) for b in nz))
    return tuple(taps)


def _conv_masks(H, W):
    # mask[t=dy*3+dx, 0, h*W+w] == 1 iff tap (h+dy-1, w+dx-1) is inside the image.
    m = np.zeros((9, 1, H * W), np.float32)
    hh = np.arange(H)[:, None]
    ww = np.arange(W)[None, :]
    for dy in range(3):
        for dx in range(3):
            valid = ((hh + dy - 1 >= 0) & (hh + dy - 1 < H) &
                     (ww + dx - 1 >= 0) & (ww + dx - 1 < W))
            m[dy * 3 + dx, 0] = valid.reshape(-1).astype(np.float32)
    return m


# ------------------------------------------------------------------ forward --
def expansion_block_forward(lowres_nchw, shortcut_nchw, params, scale=2,
                            dot_dtype=jnp.float32):
    N, Cl, Hl, Wl = lowres_nchw.shape
    _, Csc, Hs, Ws = shortcut_nchw.shape
    Cout = params["w_s0"].shape[1]
    Hm, Wm = Hl * scale, Wl * scale
    has_resize = (Hm, Wm) != (Hs, Ws)
    f32 = jnp.float32

    # NCHW -> (N, C, H*W) is a free (layout-preserving) reshape.
    x = lowres_nchw.reshape(N, Cl, Hl * Wl).astype(f32)
    sc = shortcut_nchw.reshape(N, Csc, Hs * Ws).astype(f32)

    # ---- weight prep (trace time): fold BN scales, transpose for the
    #      (C-on-sublanes, spatial-on-lanes) layout, fuse 3x3 taps into one K.
    a0 = (params["w_s0"] * params["bn0_s"]).T.astype(dot_dtype)            # (Cout, Cl)
    w1 = params["w_c1"] * params["bn1_s"]
    a1a = w1[:Cout].T.astype(dot_dtype)                                    # (Cout, Cout)
    a1b = w1[Cout:].T.astype(dot_dtype)                                    # (Cout, Csc)
    k1 = jnp.transpose(params["w_r1"] * params["rbn1_s"], (0, 2, 1))       # (9,Cout,Cin)
    w3a = jnp.transpose(k1, (1, 0, 2)).reshape(Cout, 9 * Cout).astype(dot_dtype)
    k2 = jnp.transpose(params["w_r2"] * params["rbn2_s"], (0, 2, 1))
    w3b = jnp.transpose(k2, (1, 0, 2)).reshape(Cout, 9 * Cout).astype(dot_dtype)

    bias = jnp.concatenate(
        [params["bn0_b"].reshape(Cout, 1), params["bn1_b"].reshape(Cout, 1),
         params["rbn1_b"].reshape(Cout, 1), params["rbn2_b"].reshape(Cout, 1)],
        axis=1).astype(f32)                                                # (Cout, 4)

    # separable align_corners bilinear factors (tiny; replaces the dense kron)
    uw_up = jnp.asarray(_bilinear_matrix(Wm, Wl).T).astype(dot_dtype)      # (Wl, Wm)
    taps_up = _row_taps(_bilinear_matrix(Hm, Hl))
    masks = jnp.asarray(_conv_masks(Hs, Ws))                               # (9,1,HsWs)

    operands = [x, sc, a0, uw_up]
    in_specs = [
        pl.BlockSpec((1, Cl, Hl * Wl), lambda n: (n, 0, 0)),
        pl.BlockSpec((1, Csc, Hs * Ws), lambda n: (n, 0, 0)),
        pl.BlockSpec((Cout, Cl), lambda n: (0, 0)),
        pl.BlockSpec((Wl, Wm), lambda n: (0, 0)),
    ]
    taps_rs = ()
    if has_resize:
        uw_rs = jnp.asarray(_bilinear_matrix(Ws, Wm).T).astype(dot_dtype)  # (Wm, Ws)
        taps_rs = _row_taps(_bilinear_matrix(Hs, Hm))
        operands.append(uw_rs)
        in_specs.append(pl.BlockSpec((Wm, Ws), lambda n: (0, 0)))
    operands += [a1a, a1b, w3a, w3b, bias, masks]
    in_specs += [
        pl.BlockSpec((Cout, Cout), lambda n: (0, 0)),
        pl.BlockSpec((Cout, Csc), lambda n: (0, 0)),
        pl.BlockSpec((Cout, 9 * Cout), lambda n: (0, 0)),
        pl.BlockSpec((Cout, 9 * Cout), lambda n: (0, 0)),
        pl.BlockSpec((Cout, 4), lambda n: (0, 0)),
        pl.BlockSpec((9, 1, Hs * Ws), lambda n: (0, 0, 0)),
    ]

    kern = functools.partial(
        _expansion_kernel, Hl=Hl, Wl=Wl, Hm=Hm, Wm=Wm, Ws=Ws, HWs=Hs * Ws,
        h_taps_up=taps_up, h_taps_rs=taps_rs, has_resize=has_resize,
        dot_dtype=dot_dtype)

    out = pl.pallas_call(
        kern,
        out_shape=jax.ShapeDtypeStruct((N, Cout, Hs * Ws), f32),
        grid=(N,),
        in_specs=in_specs,
        out_specs=pl.BlockSpec((1, Cout, Hs * Ws), lambda n: (n, 0, 0)),
        compiler_params=pltpu.CompilerParams(
            dimension_semantics=("parallel",)),
    )(*operands)
    return out.reshape(N, Cout, Hs, Ws)          # already NCHW; reshape is free


# --------------------------------------------------------- pure-JAX reference --
def _reference_forward(lowres, shortcut, params, scale=2):
    N, Cl, Hl, Wl = lowres.shape
    _, Csc, Hs, Ws = shortcut.shape
    Cout = params["w_s0"].shape[1]
    Hm, Wm = Hl * scale, Wl * scale
    hi = jax.lax.Precision.HIGHEST
    x = lowres.astype(jnp.float32)

    h = jnp.einsum("nchw,co->nohw", x, params["w_s0"], precision=hi)
    uh = jnp.asarray(_bilinear_matrix(Hm, Hl))
    uw = jnp.asarray(_bilinear_matrix(Wm, Wl))
    h = jnp.einsum("ab,ncbw->ncaw", uh, h, precision=hi)
    h = jnp.einsum("ab,nchb->ncha", uw, h, precision=hi)
    h = jnp.maximum(h * params["bn0_s"].reshape(1, Cout, 1, 1)
                    + params["bn0_b"].reshape(1, Cout, 1, 1), 0.0)
    if (Hm, Wm) != (Hs, Ws):
        rh = jnp.asarray(_bilinear_matrix(Hs, Hm))
        rw = jnp.asarray(_bilinear_matrix(Ws, Wm))
        h = jnp.einsum("ab,ncbw->ncaw", rh, h, precision=hi)
        h = jnp.einsum("ab,nchb->ncha", rw, h, precision=hi)
    cat = jnp.concatenate([h, shortcut.astype(jnp.float32)], axis=1)
    h = jnp.einsum("nchw,co->nohw", cat, params["w_c1"], precision=hi)
    h = jnp.maximum(h * params["bn1_s"].reshape(1, Cout, 1, 1)
                    + params["bn1_b"].reshape(1, Cout, 1, 1), 0.0)

    def conv3x3(z, w9):
        cin = z.shape[1]
        w = jnp.transpose(w9.reshape(3, 3, cin, -1), (3, 2, 0, 1))   # OIHW
        return jax.lax.conv_general_dilated(
            z, w, window_strides=(1, 1), padding="SAME",
            dimension_numbers=("NCHW", "OIHW", "NCHW"), precision=hi)

    y = conv3x3(h, params["w_r1"])
    y = jnp.maximum(y * params["rbn1_s"].reshape(1, Cout, 1, 1)
                    + params["rbn1_b"].reshape(1, Cout, 1, 1), 0.0)
    y = conv3x3(y, params["w_r2"])
    y = (y * params["rbn2_s"].reshape(1, Cout, 1, 1)
         + params["rbn2_b"].reshape(1, Cout, 1, 1) + h)
    return jnp.maximum(y, 0.0)


# ------------------------------------------------------------------- params --
def _fold_bn(key, c):
    k1, k2, k3, k4 = jax.random.split(key, 4)
    gamma = jax.random.uniform(k1, (c,), minval=0.8, maxval=1.2)
    beta = 0.1 * jax.random.normal(k2, (c,))
    mean = 0.1 * jax.random.normal(k3, (c,))
    var = jax.random.uniform(k4, (c,), minval=0.5, maxval=1.5)
    s = gamma / jnp.sqrt(var + 1e-5)
    b = beta - mean * s
    return (s.reshape(1, c).astype(jnp.float32),
            b.reshape(1, c).astype(jnp.float32))


def init_params(key, c_low, c_sc, c_out):
    ks = jax.random.split(key, 8)
    p = {}
    p["w_s0"] = (jax.random.normal(ks[0], (c_low, c_out)) / np.sqrt(c_low)).astype(jnp.float32)
    p["bn0_s"], p["bn0_b"] = _fold_bn(ks[1], c_out)
    p["w_c1"] = (jax.random.normal(ks[2], (c_out + c_sc, c_out)) /
                 np.sqrt(c_out + c_sc)).astype(jnp.float32)
    p["bn1_s"], p["bn1_b"] = _fold_bn(ks[3], c_out)
    p["w_r1"] = (jax.random.normal(ks[4], (9, c_out, c_out)) /
                 np.sqrt(9 * c_out)).astype(jnp.float32)
    p["rbn1_s"], p["rbn1_b"] = _fold_bn(ks[5], c_out)
    p["w_r2"] = (jax.random.normal(ks[6], (9, c_out, c_out)) /
                 np.sqrt(9 * c_out)).astype(jnp.float32)
    p["rbn2_s"], p["rbn2_b"] = _fold_bn(ks[7], c_out)
    return p


# --------------------------------------------------------------------- main --
if __name__ == "__main__":
    key = jax.random.PRNGKey(0)
    k_in1, k_in2, k_par = jax.random.split(key, 3)

    N, C_LOW, C_SC, C_OUT = 2, 8, 4, 8
    HL = WL = 8          # low-res spatial
    HS = WS = 16         # shortcut spatial (= 2x low-res -> identity resize path)
    SCALE = 2

    lowres = jax.random.normal(k_in1, (N, C_LOW, HL, WL), jnp.float32)    # NCHW
    shortcut = jax.random.normal(k_in2, (N, C_SC, HS, WS), jnp.float32)   # NCHW
    params = init_params(k_par, C_LOW, C_SC, C_OUT)

    fwd = jax.jit(functools.partial(expansion_block_forward, scale=SCALE))
    out = jax.block_until_ready(fwd(lowres, shortcut, params))
    assert out.shape == (N, C_OUT, HS, WS), out.shape
    assert bool(jnp.all(jnp.isfinite(out)))

    ref = jax.block_until_ready(
        _reference_forward(lowres, shortcut, params, scale=SCALE))
    err = float(jnp.max(jnp.abs(out - ref)))
    assert err < 5e-2, f"max |pallas - reference| = {err}"

    print("KERNEL_OK")
</pallas_src>

<mosaic_0001>
module attributes {stable_mosaic.version = 11 : i64} {
  func.func @_expansion_kernel(%arg0: i32, %arg1: memref<1x8x64xf32, #tpu.memory_space<vmem>>, %arg2: memref<1x4x256xf32, #tpu.memory_space<vmem>>, %arg3: memref<8x8xf32, #tpu.memory_space<vmem>>, %arg4: memref<8x16xf32, #tpu.memory_space<vmem>>, %arg5: memref<8x8xf32, #tpu.memory_space<vmem>>, %arg6: memref<8x4xf32, #tpu.memory_space<vmem>>, %arg7: memref<8x72xf32, #tpu.memory_space<vmem>>, %arg8: memref<8x72xf32, #tpu.memory_space<vmem>>, %arg9: memref<8x4xf32, #tpu.memory_space<vmem>>, %arg10: memref<9x1x256xf32, #tpu.memory_space<vmem>>, %arg11: memref<1x8x256xf32, #tpu.memory_space<vmem>>) attributes {dimension_semantics = [#tpu.dimension_semantics<parallel>], iteration_bounds = array<i64: 2>, scalar_prefetch = 0 : i64, scratch_operands = 0 : i64, tpu.core_type = #tpu.core_type<tc>, window_params = [{transform_indices = @transform_0, window_bounds = array<i64: 1, 8, 64>}, {transform_indices = @transform_1, window_bounds = array<i64: 1, 4, 256>}, {pipeline_mode = #tpu.pipeline_mode<synchronous>, transform_indices = @transform_2, window_bounds = array<i64: 8, 8>}, {pipeline_mode = #tpu.pipeline_mode<synchronous>, transform_indices = @transform_3, window_bounds = array<i64: 8, 16>}, {pipeline_mode = #tpu.pipeline_mode<synchronous>, transform_indices = @transform_4, window_bounds = array<i64: 8, 8>}, {pipeline_mode = #tpu.pipeline_mode<synchronous>, transform_indices = @transform_5, window_bounds = array<i64: 8, 4>}, {pipeline_mode = #tpu.pipeline_mode<synchronous>, transform_indices = @transform_6, window_bounds = array<i64: 8, 72>}, {pipeline_mode = #tpu.pipeline_mode<synchronous>, transform_indices = @transform_7, window_bounds = array<i64: 8, 72>}, {pipeline_mode = #tpu.pipeline_mode<synchronous>, transform_indices = @transform_8, window_bounds = array<i64: 8, 4>}, {pipeline_mode = #tpu.pipeline_mode<synchronous>, transform_indices = @transform_9, window_bounds = array<i64: 9, 1, 256>}, {transform_indices = @transform_10, window_bounds = array<i64: 1, 8, 256>}]} {
    %c0 = arith.constant 0 : index
    %c0_0 = arith.constant 0 : index
    %c0_1 = arith.constant 0 : index
    %0 = vector.load %arg1[%c0, %c0_0, %c0_1] : memref<1x8x64xf32, #tpu.memory_space<vmem>>, vector<1x8x64xf32>
    %1 = vector.shape_cast %0 : vector<1x8x64xf32> to vector<8x64xf32>
    %c0_2 = arith.constant 0 : index
    %c0_3 = arith.constant 0 : index
    %c0_4 = arith.constant 0 : index
    %2 = vector.load %arg2[%c0_2, %c0_3, %c0_4] : memref<1x4x256xf32, #tpu.memory_space<vmem>>, vector<1x4x256xf32>
    %3 = vector.shape_cast %2 : vector<1x4x256xf32> to vector<4x256xf32>
    %c0_5 = arith.constant 0 : index
    %c0_6 = arith.constant 0 : index
    %4 = vector.load %arg9[%c0_5, %c0_6] : memref<8x4xf32, #tpu.memory_space<vmem>>, vector<8x4xf32>
    %5 = vector.extract_strided_slice %4 {offsets = [0, 0], sizes = [8, 1], strides = [1, 1]} : vector<8x4xf32> to vector<8x1xf32>
    %6 = vector.extract_strided_slice %4 {offsets = [0, 1], sizes = [8, 1], strides = [1, 1]} : vector<8x4xf32> to vector<8x1xf32>
    %7 = vector.extract_strided_slice %4 {offsets = [0, 2], sizes = [8, 1], strides = [1, 1]} : vector<8x4xf32> to vector<8x1xf32>
    %8 = vector.extract_strided_slice %4 {offsets = [0, 3], sizes = [8, 1], strides = [1, 1]} : vector<8x4xf32> to vector<8x1xf32>
    %c0_7 = arith.constant 0 : index
    %c0_8 = arith.constant 0 : index
    %9 = vector.load %arg3[%c0_7, %c0_8] : memref<8x8xf32, #tpu.memory_space<vmem>>, vector<8x8xf32>
    %cst = arith.constant dense<0.000000e+00> : vector<8x64xf32>
    %10 = tpu.matmul %9, %1, %cst {dimension_numbers = #tpu.dot_dimension_numbers<[1], [0], [0], [1], [0, 0, 1, 1], [], []>} : vector<8x8xf32>, vector<8x64xf32>, vector<8x64xf32> -> vector<8x64xf32>
    %c0_9 = arith.constant 0 : index
    %c0_10 = arith.constant 0 : index
    %11 = vector.load %arg4[%c0_9, %c0_10] : memref<8x16xf32, #tpu.memory_space<vmem>>, vector<8x16xf32>
    %12 = vector.extract_strided_slice %10 {offsets = [0, 0], sizes = [8, 8], strides = [1, 1]} : vector<8x64xf32> to vector<8x8xf32>
    %cst_11 = arith.constant dense<0.000000e+00> : vector<8x16xf32>
    %13 = tpu.matmul %12, %11, %cst_11 {dimension_numbers = #tpu.dot_dimension_numbers<[1], [0], [0], [1], [0, 0, 1, 1], [], []>} : vector<8x8xf32>, vector<8x16xf32>, vector<8x16xf32> -> vector<8x16xf32>
    %14 = vector.extract_strided_slice %10 {offsets = [0, 8], sizes = [8, 8], strides = [1, 1]} : vector<8x64xf32> to vector<8x8xf32>
    %cst_12 = arith.constant dense<0.000000e+00> : vector<8x16xf32>
    %15 = tpu.matmul %14, %11, %cst_12 {dimension_numbers = #tpu.dot_dimension_numbers<[1], [0], [0], [1], [0, 0, 1, 1], [], []>} : vector<8x8xf32>, vector<8x16xf32>, vector<8x16xf32> -> vector<8x16xf32>
    %16 = vector.extract_strided_slice %10 {offsets = [0, 16], sizes = [8, 8], strides = [1, 1]} : vector<8x64xf32> to vector<8x8xf32>
    %cst_13 = arith.constant dense<0.000000e+00> : vector<8x16xf32>
    %17 = tpu.matmul %16, %11, %cst_13 {dimension_numbers = #tpu.dot_dimension_numbers<[1], [0], [0], [1], [0, 0, 1, 1], [], []>} : vector<8x8xf32>, vector<8x16xf32>, vector<8x16xf32> -> vector<8x16xf32>
    %18 = vector.extract_strided_slice %10 {offsets = [0, 24], sizes = [8, 8], strides = [1, 1]} : vector<8x64xf32> to vector<8x8xf32>
    %cst_14 = arith.constant dense<0.000000e+00> : vector<8x16xf32>
    %19 = tpu.matmul %18, %11, %cst_14 {dimension_numbers = #tpu.dot_dimension_numbers<[1], [0], [0], [1], [0, 0, 1, 1], [], []>} : vector<8x8xf32>, vector<8x16xf32>, vector<8x16xf32> -> vector<8x16xf32>
    %20 = vector.extract_strided_slice %10 {offsets = [0, 32], sizes = [8, 8], strides = [1, 1]} : vector<8x64xf32> to vector<8x8xf32>
    %cst_15 = arith.constant dense<0.000000e+00> : vector<8x16xf32>
    %21 = tpu.matmul %20, %11, %cst_15 {dimension_numbers = #tpu.dot_dimension_numbers<[1], [0], [0], [1], [0, 0, 1, 1], [], []>} : vector<8x8xf32>, vector<8x16xf32>, vector<8x16xf32> -> vector<8x16xf32>
    %22 = vector.extract_strided_slice %10 {offsets = [0, 40], sizes = [8, 8], strides = [1, 1]} : vector<8x64xf32> to vector<8x8xf32>
    %cst_16 = arith.constant dense<0.000000e+00> : vector<8x16xf32>
    %23 = tpu.matmul %22, %11, %cst_16 {dimension_numbers = #tpu.dot_dimension_numbers<[1], [0], [0], [1], [0, 0, 1, 1], [], []>} : vector<8x8xf32>, vector<8x16xf32>, vector<8x16xf32> -> vector<8x16xf32>
    %24 = vector.extract_strided_slice %10 {offsets = [0, 48], sizes = [8, 8], strides = [1, 1]} : vector<8x64xf32> to vector<8x8xf32>
    %cst_17 = arith.constant dense<0.000000e+00> : vector<8x16xf32>
    %25 = tpu.matmul %24, %11, %cst_17 {dimension_numbers = #tpu.dot_dimension_numbers<[1], [0], [0], [1], [0, 0, 1, 1], [], []>} : vector<8x8xf32>, vector<8x16xf32>, vector<8x16xf32> -> vector<8x16xf32>
    %26 = vector.extract_strided_slice %10 {offsets = [0, 56], sizes = [8, 8], strides = [1, 1]} : vector<8x64xf32> to vector<8x8xf32>
    %cst_18 = arith.constant dense<0.000000e+00> : vector<8x16xf32>
    %27 = tpu.matmul %26, %11, %cst_18 {dimension_numbers = #tpu.dot_dimension_numbers<[1], [0], [0], [1], [0, 0, 1, 1], [], []>} : vector<8x8xf32>, vector<8x16xf32>, vector<8x16xf32> -> vector<8x16xf32>
    %cst_19 = arith.constant 0.533333302 : f32
    %28 = vector.broadcast %cst_19 : f32 to vector<8x16xf32>
    %29 = arith.mulf %13, %28 : vector<8x16xf32>
    %cst_20 = arith.constant 0.466666669 : f32
    %30 = vector.broadcast %cst_20 : f32 to vector<8x16xf32>
    %31 = arith.mulf %15, %30 : vector<8x16xf32>
    %32 = arith.addf %29, %31 : vector<8x16xf32>
    %cst_21 = arith.constant 0.0666666627 : f32
    %33 = vector.broadcast %cst_21 : f32 to vector<8x16xf32>
    %34 = arith.mulf %13, %33 : vector<8x16xf32>
    %cst_22 = arith.constant 0.933333337 : f32
    %35 = vector.broadcast %cst_22 : f32 to vector<8x16xf32>
    %36 = arith.mulf %15, %35 : vector<8x16xf32>
    %37 = arith.addf %34, %36 : vector<8x16xf32>
    %cst_23 = arith.constant 6.000000e-01 : f32
    %38 = vector.broadcast %cst_23 : f32 to vector<8x16xf32>
    %39 = arith.mulf %15, %38 : vector<8x16xf32>
    %cst_24 = arith.constant 4.000000e-01 : f32
    %40 = vector.broadcast %cst_24 : f32 to vector<8x16xf32>
    %41 = arith.mulf %17, %40 : vector<8x16xf32>
    %42 = arith.addf %39, %41 : vector<8x16xf32>
    %cst_25 = arith.constant 0.133333325 : f32
    %43 = vector.broadcast %cst_25 : f32 to vector<8x16xf32>
    %44 = arith.mulf %15, %43 : vector<8x16xf32>
    %cst_26 = arith.constant 0.866666674 : f32
    %45 = vector.broadcast %cst_26 : f32 to vector<8x16xf32>
    %46 = arith.mulf %17, %45 : vector<8x16xf32>
    %47 = arith.addf %44, %46 : vector<8x16xf32>
    %cst_27 = arith.constant 0.666666627 : f32
    %48 = vector.broadcast %cst_27 : f32 to vector<8x16xf32>
    %49 = arith.mulf %17, %48 : vector<8x16xf32>
    %cst_28 = arith.constant 0.333333343 : f32
    %50 = vector.broadcast %cst_28 : f32 to vector<8x16xf32>
    %51 = arith.mulf %19, %50 : vector<8x16xf32>
    %52 = arith.addf %49, %51 : vector<8x16xf32>
    %cst_29 = arith.constant 0.199999988 : f32
    %53 = vector.broadcast %cst_29 : f32 to vector<8x16xf32>
    %54 = arith.mulf %17, %53 : vector<8x16xf32>
    %cst_30 = arith.constant 8.000000e-01 : f32
    %55 = vector.broadcast %cst_30 : f32 to vector<8x16xf32>
    %56 = arith.mulf %19, %55 : vector<8x16xf32>
    %57 = arith.addf %54, %56 : vector<8x16xf32>
    %cst_31 = arith.constant 0.733333349 : f32
    %58 = vector.broadcast %cst_31 : f32 to vector<8x16xf32>
    %59 = arith.mulf %19, %58 : vector<8x16xf32>
    %cst_32 = arith.constant 0.266666681 : f32
    %60 = vector.broadcast %cst_32 : f32 to vector<8x16xf32>
    %61 = arith.mulf %21, %60 : vector<8x16xf32>
    %62 = arith.addf %59, %61 : vector<8x16xf32>
    %cst_33 = arith.constant 0.266666651 : f32
    %63 = vector.broadcast %cst_33 : f32 to vector<8x16xf32>
    %64 = arith.mulf %19, %63 : vector<8x16xf32>
    %cst_34 = arith.constant 0.733333349 : f32
    %65 = vector.broadcast %cst_34 : f32 to vector<8x16xf32>
    %66 = arith.mulf %21, %65 : vector<8x16xf32>
    %67 = arith.addf %64, %66 : vector<8x16xf32>
    %cst_35 = arith.constant 8.000000e-01 : f32
    %68 = vector.broadcast %cst_35 : f32 to vector<8x16xf32>
    %69 = arith.mulf %21, %68 : vector<8x16xf32>
    %cst_36 = arith.constant 2.000000e-01 : f32
    %70 = vector.broadcast %cst_36 : f32 to vector<8x16xf32>
    %71 = arith.mulf %23, %70 : vector<8x16xf32>
    %72 = arith.addf %69, %71 : vector<8x16xf32>
    %cst_37 = arith.constant 0.333333313 : f32
    %73 = vector.broadcast %cst_37 : f32 to vector<8x16xf32>
    %74 = arith.mulf %21, %73 : vector<8x16xf32>
    %cst_38 = arith.constant 0.666666686 : f32
    %75 = vector.broadcast %cst_38 : f32 to vector<8x16xf32>
    %76 = arith.mulf %23, %75 : vector<8x16xf32>
    %77 = arith.addf %74, %76 : vector<8x16xf32>
    %cst_39 = arith.constant 0.866666674 : f32
    %78 = vector.broadcast %cst_39 : f32 to vector<8x16xf32>
    %79 = arith.mulf %23, %78 : vector<8x16xf32>
    %cst_40 = arith.constant 0.13333334 : f32
    %80 = vector.broadcast %cst_40 : f32 to vector<8x16xf32>
    %81 = arith.mulf %25, %80 : vector<8x16xf32>
    %82 = arith.addf %79, %81 : vector<8x16xf32>
    %cst_41 = arith.constant 0.399999976 : f32
    %83 = vector.broadcast %cst_41 : f32 to vector<8x16xf32>
    %84 = arith.mulf %23, %83 : vector<8x16xf32>
    %cst_42 = arith.constant 6.000000e-01 : f32
    %85 = vector.broadcast %cst_42 : f32 to vector<8x16xf32>
    %86 = arith.mulf %25, %85 : vector<8x16xf32>
    %87 = arith.addf %84, %86 : vector<8x16xf32>
    %cst_43 = arith.constant 0.933333337 : f32
    %88 = vector.broadcast %cst_43 : f32 to vector<8x16xf32>
    %89 = arith.mulf %25, %88 : vector<8x16xf32>
    %cst_44 = arith.constant 0.0666666701 : f32
    %90 = vector.broadcast %cst_44 : f32 to vector<8x16xf32>
    %91 = arith.mulf %27, %90 : vector<8x16xf32>
    %92 = arith.addf %89, %91 : vector<8x16xf32>
    %cst_45 = arith.constant 0.466666639 : f32
    %93 = vector.broadcast %cst_45 : f32 to vector<8x16xf32>
    %94 = arith.mulf %25, %93 : vector<8x16xf32>
    %cst_46 = arith.constant 0.533333361 : f32
    %95 = vector.broadcast %cst_46 : f32 to vector<8x16xf32>
    %96 = arith.mulf %27, %95 : vector<8x16xf32>
    %97 = arith.addf %94, %96 : vector<8x16xf32>
    %98 = tpu.concatenate %13, %32, %37, %42, %47, %52, %57, %62, %67, %72, %77, %82, %87, %92, %97, %27 in 1 : vector<8x16xf32>, vector<8x16xf32>, vector<8x16xf32>, vector<8x16xf32>, vector<8x16xf32>, vector<8x16xf32>, vector<8x16xf32>, vector<8x16xf32>, vector<8x16xf32>, vector<8x16xf32>, vector<8x16xf32>, vector<8x16xf32>, vector<8x16xf32>, vector<8x16xf32>, vector<8x16xf32>, vector<8x16xf32> -> vector<8x256xf32>
    %99 = vector.broadcast %5 : vector<8x1xf32> to vector<8x256xf32>
    %100 = arith.addf %98, %99 : vector<8x256xf32>
    %cst_47 = arith.constant 0.000000e+00 : f32
    %101 = vector.broadcast %cst_47 : f32 to vector<8x256xf32>
    %102 = arith.maximumf %100, %101 : vector<8x256xf32>
    %c0_48 = arith.constant 0 : index
    %c0_49 = arith.constant 0 : index
    %103 = vector.load %arg5[%c0_48, %c0_49] : memref<8x8xf32, #tpu.memory_space<vmem>>, vector<8x8xf32>
    %cst_50 = arith.constant dense<0.000000e+00> : vector<8x256xf32>
    %104 = tpu.matmul %103, %102, %cst_50 {dimension_numbers = #tpu.dot_dimension_numbers<[1], [0], [0], [1], [0, 0, 1, 1], [], []>} : vector<8x8xf32>, vector<8x256xf32>, vector<8x256xf32> -> vector<8x256xf32>
    %c0_51 = arith.constant 0 : index
    %c0_52 = arith.constant 0 : index
    %105 = vector.load %arg6[%c0_51, %c0_52] : memref<8x4xf32, #tpu.memory_space<vmem>>, vector<8x4xf32>
    %cst_53 = arith.constant dense<0.000000e+00> : vector<8x256xf32>
    %106 = tpu.matmul %105, %3, %cst_53 {dimension_numbers = #tpu.dot_dimension_numbers<[1], [0], [0], [1], [0, 0, 1, 1], [], []>} : vector<8x4xf32>, vector<4x256xf32>, vector<8x256xf32> -> vector<8x256xf32>
    %107 = arith.addf %104, %106 : vector<8x256xf32>
    %108 = vector.broadcast %6 : vector<8x1xf32> to vector<8x256xf32>
    %109 = arith.addf %107, %108 : vector<8x256xf32>
    %cst_54 = arith.constant 0.000000e+00 : f32
    %110 = vector.broadcast %cst_54 : f32 to vector<8x256xf32>
    %111 = arith.maximumf %109, %110 : vector<8x256xf32>
    %c0_55 = arith.constant 0 : index
    %c0_56 = arith.constant 0 : index
    %112 = vector.load %arg7[%c0_55, %c0_56] : memref<8x72xf32, #tpu.memory_space<vmem>>, vector<8x72xf32>
    %c17_i32 = arith.constant 17 : i32
    %113 = tpu.dynamic_rotate %111 by %c17_i32 dim 1 : vector<8x256xf32>, i32 -> vector<8x256xf32>
    %c0_57 = arith.constant 0 : index
    %c0_58 = arith.constant 0 : index
    %c0_59 = arith.constant 0 : index
    %114 = vector.load %arg10[%c0_57, %c0_58, %c0_59] : memref<9x1x256xf32, #tpu.memory_space<vmem>>, vector<1x1x256xf32>
    %115 = vector.shape_cast %114 : vector<1x1x256xf32> to vector<1x256xf32>
    %116 = vector.broadcast %115 : vector<1x256xf32> to vector<8x256xf32>
    %117 = arith.mulf %113, %116 : vector<8x256xf32>
    %c16_i32 = arith.constant 16 : i32
    %118 = tpu.dynamic_rotate %111 by %c16_i32 dim 1 : vector<8x256xf32>, i32 -> vector<8x256xf32>
    %c1 = arith.constant 1 : index
    %c0_60 = arith.constant 0 : index
    %c0_61 = arith.constant 0 : index
    %119 = vector.load %arg10[%c1, %c0_60, %c0_61] : memref<9x1x256xf32, #tpu.memory_space<vmem>>, vector<1x1x256xf32>
    %120 = vector.shape_cast %119 : vector<1x1x256xf32> to vector<1x256xf32>
    %121 = vector.broadcast %120 : vector<1x256xf32> to vector<8x256xf32>
    %122 = arith.mulf %118, %121 : vector<8x256xf32>
    %c15_i32 = arith.constant 15 : i32
    %123 = tpu.dynamic_rotate %111 by %c15_i32 dim 1 : vector<8x256xf32>, i32 -> vector<8x256xf32>
    %c2 = arith.constant 2 : index
    %c0_62 = arith.constant 0 : index
    %c0_63 = arith.constant 0 : index
    %124 = vector.load %arg10[%c2, %c0_62, %c0_63] : memref<9x1x256xf32, #tpu.memory_space<vmem>>, vector<1x1x256xf32>
    %125 = vector.shape_cast %124 : vector<1x1x256xf32> to vector<1x256xf32>
    %126 = vector.broadcast %125 : vector<1x256xf32> to vector<8x256xf32>
    %127 = arith.mulf %123, %126 : vector<8x256xf32>
    %c1_i32 = arith.constant 1 : i32
    %128 = tpu.dynamic_rotate %111 by %c1_i32 dim 1 : vector<8x256xf32>, i32 -> vector<8x256xf32>
    %c3 = arith.constant 3 : index
    %c0_64 = arith.constant 0 : index
    %c0_65 = arith.constant 0 : index
    %129 = vector.load %arg10[%c3, %c0_64, %c0_65] : memref<9x1x256xf32, #tpu.memory_space<vmem>>, vector<1x1x256xf32>
    %130 = vector.shape_cast %129 : vector<1x1x256xf32> to vector<1x256xf32>
    %131 = vector.broadcast %130 : vector<1x256xf32> to vector<8x256xf32>
    %132 = arith.mulf %128, %131 : vector<8x256xf32>
    %c255_i32 = arith.constant 255 : i32
    %133 = tpu.dynamic_rotate %111 by %c255_i32 dim 1 : vector<8x256xf32>, i32 -> vector<8x256xf32>
    %c5 = arith.constant 5 : index
    %c0_66 = arith.constant 0 : index
    %c0_67 = arith.constant 0 : index
    %134 = vector.load %arg10[%c5, %c0_66, %c0_67] : memref<9x1x256xf32, #tpu.memory_space<vmem>>, vector<1x1x256xf32>
    %135 = vector.shape_cast %134 : vector<1x1x256xf32> to vector<1x256xf32>
    %136 = vector.broadcast %135 : vector<1x256xf32> to vector<8x256xf32>
    %137 = arith.mulf %133, %136 : vector<8x256xf32>
    %c241_i32 = arith.constant 241 : i32
    %138 = tpu.dynamic_rotate %111 by %c241_i32 dim 1 : vector<8x256xf32>, i32 -> vector<8x256xf32>
    %c6 = arith.constant 6 : index
    %c0_68 = arith.constant 0 : index
    %c0_69 = arith.constant 0 : index
    %139 = vector.load %arg10[%c6, %c0_68, %c0_69] : memref<9x1x256xf32, #tpu.memory_space<vmem>>, vector<1x1x256xf32>
    %140 = vector.shape_cast %139 : vector<1x1x256xf32> to vector<1x256xf32>
    %141 = vector.broadcast %140 : vector<1x256xf32> to vector<8x256xf32>
    %142 = arith.mulf %138, %141 : vector<8x256xf32>
    %c240_i32 = arith.constant 240 : i32
    %143 = tpu.dynamic_rotate %111 by %c240_i32 dim 1 : vector<8x256xf32>, i32 -> vector<8x256xf32>
    %c7 = arith.constant 7 : index
    %c0_70 = arith.constant 0 : index
    %c0_71 = arith.constant 0 : index
    %144 = vector.load %arg10[%c7, %c0_70, %c0_71] : memref<9x1x256xf32, #tpu.memory_space<vmem>>, vector<1x1x256xf32>
    %145 = vector.shape_cast %144 : vector<1x1x256xf32> to vector<1x256xf32>
    %146 = vector.broadcast %145 : vector<1x256xf32> to vector<8x256xf32>
    %147 = arith.mulf %143, %146 : vector<8x256xf32>
    %c239_i32 = arith.constant 239 : i32
    %148 = tpu.dynamic_rotate %111 by %c239_i32 dim 1 : vector<8x256xf32>, i32 -> vector<8x256xf32>
    %c8 = arith.constant 8 : index
    %c0_72 = arith.constant 0 : index
    %c0_73 = arith.constant 0 : index
    %149 = vector.load %arg10[%c8, %c0_72, %c0_73] : memref<9x1x256xf32, #tpu.memory_space<vmem>>, vector<1x1x256xf32>
    %150 = vector.shape_cast %149 : vector<1x1x256xf32> to vector<1x256xf32>
    %151 = vector.broadcast %150 : vector<1x256xf32> to vector<8x256xf32>
    %152 = arith.mulf %148, %151 : vector<8x256xf32>
    %153 = tpu.concatenate %117, %122, %127, %132, %111, %137, %142, %147, %152 in 0 : vector<8x256xf32>, vector<8x256xf32>, vector<8x256xf32>, vector<8x256xf32>, vector<8x256xf32>, vector<8x256xf32>, vector<8x256xf32>, vector<8x256xf32>, vector<8x256xf32> -> vector<72x256xf32>
    %cst_74 = arith.constant dense<0.000000e+00> : vector<8x256xf32>
    %154 = tpu.matmul %112, %153, %cst_74 {dimension_numbers = #tpu.dot_dimension_numbers<[1], [0], [0], [1], [0, 0, 1, 1], [], []>} : vector<8x72xf32>, vector<72x256xf32>, vector<8x256xf32> -> vector<8x256xf32>
    %155 = vector.broadcast %7 : vector<8x1xf32> to vector<8x256xf32>
    %156 = arith.addf %154, %155 : vector<8x256xf32>
    %cst_75 = arith.constant 0.000000e+00 : f32
    %157 = vector.broadcast %cst_75 : f32 to vector<8x256xf32>
    %158 = arith.maximumf %156, %157 : vector<8x256xf32>
    %c0_76 = arith.constant 0 : index
    %c0_77 = arith.constant 0 : index
    %159 = vector.load %arg8[%c0_76, %c0_77] : memref<8x72xf32, #tpu.memory_space<vmem>>, vector<8x72xf32>
    %c17_i32_78 = arith.constant 17 : i32
    %160 = tpu.dynamic_rotate %158 by %c17_i32_78 dim 1 : vector<8x256xf32>, i32 -> vector<8x256xf32>
    %c0_79 = arith.constant 0 : index
    %c0_80 = arith.constant 0 : index
    %c0_81 = arith.constant 0 : index
    %161 = vector.load %arg10[%c0_79, %c0_80, %c0_81] : memref<9x1x256xf32, #tpu.memory_space<vmem>>, vector<1x1x256xf32>
    %162 = vector.shape_cast %161 : vector<1x1x256xf32> to vector<1x256xf32>
    %163 = vector.broadcast %162 : vector<1x256xf32> to vector<8x256xf32>
    %164 = arith.mulf %160, %163 : vector<8x256xf32>
    %c16_i32_82 = arith.constant 16 : i32
    %165 = tpu.dynamic_rotate %158 by %c16_i32_82 dim 1 : vector<8x256xf32>, i32 -> vector<8x256xf32>
    %c1_83 = arith.constant 1 : index
    %c0_84 = arith.constant 0 : index
    %c0_85 = arith.constant 0 : index
    %166 = vector.load %arg10[%c1_83, %c0_84, %c0_85] : memref<9x1x256xf32, #tpu.memory_space<vmem>>, vector<1x1x256xf32>
    %167 = vector.shape_cast %166 : vector<1x1x256xf32> to vector<1x256xf32>
    %168 = vector.broadcast %167 : vector<1x256xf32> to vector<8x256xf32>
    %169 = arith.mulf %165, %168 : vector<8x256xf32>
    %c15_i32_86 = arith.constant 15 : i32
    %170 = tpu.dynamic_rotate %158 by %c15_i32_86 dim 1 : vector<8x256xf32>, i32 -> vector<8x256xf32>
    %c2_87 = arith.constant 2 : index
    %c0_88 = arith.constant 0 : index
    %c0_89 = arith.constant 0 : index
    %171 = vector.load %arg10[%c2_87, %c0_88, %c0_89] : memref<9x1x256xf32, #tpu.memory_space<vmem>>, vector<1x1x256xf32>
    %172 = vector.shape_cast %171 : vector<1x1x256xf32> to vector<1x256xf32>
    %173 = vector.broadcast %172 : vector<1x256xf32> to vector<8x256xf32>
    %174 = arith.mulf %170, %173 : vector<8x256xf32>
    %c1_i32_90 = arith.constant 1 : i32
    %175 = tpu.dynamic_rotate %158 by %c1_i32_90 dim 1 : vector<8x256xf32>, i32 -> vector<8x256xf32>
    %c3_91 = arith.constant 3 : index
    %c0_92 = arith.constant 0 : index
    %c0_93 = arith.constant 0 : index
    %176 = vector.load %arg10[%c3_91, %c0_92, %c0_93] : memref<9x1x256xf32, #tpu.memory_space<vmem>>, vector<1x1x256xf32>
    %177 = vector.shape_cast %176 : vector<1x1x256xf32> to vector<1x256xf32>
    %178 = vector.broadcast %177 : vector<1x256xf32> to vector<8x256xf32>
    %179 = arith.mulf %175, %178 : vector<8x256xf32>
    %c255_i32_94 = arith.constant 255 : i32
    %180 = tpu.dynamic_rotate %158 by %c255_i32_94 dim 1 : vector<8x256xf32>, i32 -> vector<8x256xf32>
    %c5_95 = arith.constant 5 : index
    %c0_96 = arith.constant 0 : index
    %c0_97 = arith.constant 0 : index
    %181 = vector.load %arg10[%c5_95, %c0_96, %c0_97] : memref<9x1x256xf32, #tpu.memory_space<vmem>>, vector<1x1x256xf32>
    %182 = vector.shape_cast %181 : vector<1x1x256xf32> to vector<1x256xf32>
    %183 = vector.broadcast %182 : vector<1x256xf32> to vector<8x256xf32>
    %184 = arith.mulf %180, %183 : vector<8x256xf32>
    %c241_i32_98 = arith.constant 241 : i32
    %185 = tpu.dynamic_rotate %158 by %c241_i32_98 dim 1 : vector<8x256xf32>, i32 -> vector<8x256xf32>
    %c6_99 = arith.constant 6 : index
    %c0_100 = arith.constant 0 : index
    %c0_101 = arith.constant 0 : index
    %186 = vector.load %arg10[%c6_99, %c0_100, %c0_101] : memref<9x1x256xf32, #tpu.memory_space<vmem>>, vector<1x1x256xf32>
    %187 = vector.shape_cast %186 : vector<1x1x256xf32> to vector<1x256xf32>
    %188 = vector.broadcast %187 : vector<1x256xf32> to vector<8x256xf32>
    %189 = arith.mulf %185, %188 : vector<8x256xf32>
    %c240_i32_102 = arith.constant 240 : i32
    %190 = tpu.dynamic_rotate %158 by %c240_i32_102 dim 1 : vector<8x256xf32>, i32 -> vector<8x256xf32>
    %c7_103 = arith.constant 7 : index
    %c0_104 = arith.constant 0 : index
    %c0_105 = arith.constant 0 : index
    %191 = vector.load %arg10[%c7_103, %c0_104, %c0_105] : memref<9x1x256xf32, #tpu.memory_space<vmem>>, vector<1x1x256xf32>
    %192 = vector.shape_cast %191 : vector<1x1x256xf32> to vector<1x256xf32>
    %193 = vector.broadcast %192 : vector<1x256xf32> to vector<8x256xf32>
    %194 = arith.mulf %190, %193 : vector<8x256xf32>
    %c239_i32_106 = arith.constant 239 : i32
    %195 = tpu.dynamic_rotate %158 by %c239_i32_106 dim 1 : vector<8x256xf32>, i32 -> vector<8x256xf32>
    %c8_107 = arith.constant 8 : index
    %c0_108 = arith.constant 0 : index
    %c0_109 = arith.constant 0 : index
    %196 = vector.load %arg10[%c8_107, %c0_108, %c0_109] : memref<9x1x256xf32, #tpu.memory_space<vmem>>, vector<1x1x256xf32>
    %197 = vector.shape_cast %196 : vector<1x1x256xf32> to vector<1x256xf32>
    %198 = vector.broadcast %197 : vector<1x256xf32> to vector<8x256xf32>
    %199 = arith.mulf %195, %198 : vector<8x256xf32>
    %200 = tpu.concatenate %164, %169, %174, %179, %158, %184, %189, %194, %199 in 0 : vector<8x256xf32>, vector<8x256xf32>, vector<8x256xf32>, vector<8x256xf32>, vector<8x256xf32>, vector<8x256xf32>, vector<8x256xf32>, vector<8x256xf32>, vector<8x256xf32> -> vector<72x256xf32>
    %cst_110 = arith.constant dense<0.000000e+00> : vector<8x256xf32>
    %201 = tpu.matmul %159, %200, %cst_110 {dimension_numbers = #tpu.dot_dimension_numbers<[1], [0], [0], [1], [0, 0, 1, 1], [], []>} : vector<8x72xf32>, vector<72x256xf32>, vector<8x256xf32> -> vector<8x256xf32>
    %202 = vector.broadcast %8 : vector<8x1xf32> to vector<8x256xf32>
    %203 = arith.addf %201, %202 : vector<8x256xf32>
    %204 = arith.addf %203, %111 : vector<8x256xf32>
    %cst_111 = arith.constant 0.000000e+00 : f32
    %205 = vector.broadcast %cst_111 : f32 to vector<8x256xf32>
    %206 = arith.maximumf %204, %205 : vector<8x256xf32>
    %c0_112 = arith.constant 0 : index
    %c0_113 = arith.constant 0 : index
    %c0_114 = arith.constant 0 : index
    %207 = vector.load %arg11[%c0_112, %c0_113, %c0_114] : memref<1x8x256xf32, #tpu.memory_space<vmem>>, vector<1x8x256xf32>
    %208 = vector.shape_cast %207 : vector<1x8x256xf32> to vector<8x256xf32>
    %209 = vector.shape_cast %206 : vector<8x256xf32> to vector<1x8x256xf32>
    tpu.vector_store %arg11[%c0_112, %c0_113, %c0_114], %209 {strides = array<i32>} : memref<1x8x256xf32, #tpu.memory_space<vmem>>, vector<1x8x256xf32>,
    return
  }
  func.func @transform_0(%arg0: i32) -> (i32, i32, i32) {
    %c0_i32 = arith.constant 0 : i32
    %c0_i32_0 = arith.constant 0 : i32
    %c0_i32_1 = arith.constant 0 : i32
    return %arg0, %c0_i32, %c0_i32_0 : i32, i32, i32
  }
  func.func @transform_1(%arg0: i32) -> (i32, i32, i32) {
    %c0_i32 = arith.constant 0 : i32
    %c0_i32_0 = arith.constant 0 : i32
    %c0_i32_1 = arith.constant 0 : i32
    return %arg0, %c0_i32, %c0_i32_0 : i32, i32, i32
  }
  func.func @transform_2(%arg0: i32) -> (i32, i32) {
    %c0_i32 = arith.constant 0 : i32
    %c0_i32_0 = arith.constant 0 : i32
    %c0_i32_1 = arith.constant 0 : i32
    return %c0_i32, %c0_i32_0 : i32, i32
  }
  func.func @transform_3(%arg0: i32) -> (i32, i32) {
    %c0_i32 = arith.constant 0 : i32
    %c0_i32_0 = arith.constant 0 : i32
    %c0_i32_1 = arith.constant 0 : i32
    return %c0_i32, %c0_i32_0 : i32, i32
  }
  func.func @transform_4(%arg0: i32) -> (i32, i32) {
    %c0_i32 = arith.constant 0 : i32
    %c0_i32_0 = arith.constant 0 : i32
    %c0_i32_1 = arith.constant 0 : i32
    return %c0_i32, %c0_i32_0 : i32, i32
  }
  func.func @transform_5(%arg0: i32) -> (i32, i32) {
    %c0_i32 = arith.constant 0 : i32
    %c0_i32_0 = arith.constant 0 : i32
    %c0_i32_1 = arith.constant 0 : i32
    return %c0_i32, %c0_i32_0 : i32, i32
  }
  func.func @transform_6(%arg0: i32) -> (i32, i32) {
    %c0_i32 = arith.constant 0 : i32
    %c0_i32_0 = arith.constant 0 : i32
    %c0_i32_1 = arith.constant 0 : i32
    return %c0_i32, %c0_i32_0 : i32, i32
  }
  func.func @transform_7(%arg0: i32) -> (i32, i32) {
    %c0_i32 = arith.constant 0 : i32
    %c0_i32_0 = arith.constant 0 : i32
    %c0_i32_1 = arith.constant 0 : i32
    return %c0_i32, %c0_i32_0 : i32, i32
  }
  func.func @transform_8(%arg0: i32) -> (i32, i32) {
    %c0_i32 = arith.constant 0 : i32
    %c0_i32_0 = arith.constant 0 : i32
    %c0_i32_1 = arith.constant 0 : i32
    return %c0_i32, %c0_i32_0 : i32, i32
  }
  func.func @transform_9(%arg0: i32) -> (i32, i32, i32) {
    %c0_i32 = arith.constant 0 : i32
    %c0_i32_0 = arith.constant 0 : i32
    %c0_i32_1 = arith.constant 0 : i32
    %c0_i32_2 = arith.constant 0 : i32
    return %c0_i32, %c0_i32_0, %c0_i32_1 : i32, i32, i32
  }
  func.func @transform_10(%arg0: i32) -> (i32, i32, i32) {
    %c0_i32 = arith.constant 0 : i32
    %c0_i32_0 = arith.constant 0 : i32
    %c0_i32_1 = arith.constant 0 : i32
    return %arg0, %c0_i32, %c0_i32_0 : i32, i32, i32
  }
}

</mosaic_0001>

<bundles_post_ra>
// kernel: expansion_block_forward.1
= control target key start
LH: loop header
LB: loop body
LE: loop exit
PB: predicated region body
PF: predicated region fallthrough
CT: control target
= control target key end

     0   :  { %s2071_s13 = smov 0   ;;  %s2443_s0 = inlined_call_operand.vmem [shape: f32[2,8,64], index: 0, kind: input, shape index: {}]   ;;  %s2444_s1 = inlined_call_operand.vmem [shape: f32[2,4,256], index: 1, kind: input, shape index: {}]   ;;  %s2445_s2 = inlined_call_operand.vmem [shape: f32[8,8], index: 2, kind: input, shape index: {}]   ;;  %s2446_s3 = inlined_call_operand.vmem [shape: f32[8,16], index: 3, kind: input, shape index: {}]   ;;  %s2447_s4 = inlined_call_operand.vmem [shape: f32[8,8], index: 4, kind: input, shape index: {}]   ;;  %s2448_s5 = inlined_call_operand.vmem [shape: f32[8,4], index: 5, kind: input, shape index: {}]   ;;  %s2449_s6 = inlined_call_operand.vmem [shape: f32[8,72], index: 6, kind: input, shape index: {}]   ;;  %s2450_s7 = inlined_call_operand.vmem [shape: f32[8,72], index: 7, kind: input, shape index: {}]   ;;  %s2451_s8 = inlined_call_operand.vmem [shape: f32[8,4], index: 8, kind: input, shape index: {}]   ;;  %s2452_s9 = inlined_call_operand.vmem [shape: f32[9,1,256], index: 9, kind: input, shape index: {}]   ;;  %s2453_s10 = inlined_call_operand.vmem [shape: f32[2,8,256], index: 10, kind: output, shape index: {}]  }
   0x1 LB: > { %s1816_s14 = sadd.s32 4294967295, %s1991_s13   ;;  %p1820_p0 = scmp.ge.s32.totalorder %s1991_s13, 1  ;;  %s1991_s13 = sphi %s2071_s13, %s20_s13  }
   0x2   : > { %p321_p1 = scmp.lt.s32.totalorder %s1991_s13, 3 }
   0x4   : > { %p322_p2 = pnand %p1820_p0, %p321_p1 }
   0x5   : > { %p363_p3 = scmp.lt.s32.totalorder (!%p322_p2), %s1816_s14, 1  ;;  %v1993_v0 = vmov (!%p322_p2), 0.0   ;;  %vm1994_vm0 = vmmov (!%p322_p2), 0   ;;  %v380_v1 = vld [vmem:[%s2445_s2] sm:$0xff] (!%p322_p2)  ;;  %vm381_vm1 = vcmask (!%p322_p2), 64512   ;;  %s1995_s23 = smov (!%p322_p2), 104  }
   0x6   : > { %325 = sbr.rel (%p322_p2) target bundleno = 1673 (0x689), region = 60  ;;  %1870 = vmatprep.subr.mxu0 (!%p322_p2), %v1993_v0  ;;  %1872 = vmatprep.mubr.msk.f32.mxu0 (!%p322_p2), %vm1994_vm0, %v1993_v0  ;;  %v455_v3 = vld [vmem:[%s2446_s3] sm:$0xff] (!%p322_p2)  ;;  %s1996_s24 = smov (!%p322_p2), 120   ;;  %v2002_v7 = vmov (!%p322_p2), 0   ;;  %vm1183_vm2 = vcmask (!%p322_p2), 1043456   ;;  %vm1179_vm3 = vcmask (!%p322_p2), 31744  }
   0x7   : > { %1875 = vmatprep.subr.mxu1 (!%p322_p2), %v1993_v0  ;;  %1877 = vmatprep.mubr.msk.f32.mxu1 (!%p322_p2), %vm1994_vm0, %v1993_v0  ;;  %s1997_s25 = smov (!%p322_p2), 96   ;;  %s1998_s26 = smov (!%p322_p2), 112   ;;  %v2115_v6 = vld [vmem:[%s2451_s8] sm:$0xff] (!%p322_p2)  ;;  %vm1145_vm4 = vcmask (!%p322_p2), 130048   ;;  %vm1147_vm5 = vcmask (!%p322_p2), 261120   ;;  %vm1149_vm6 = vcmask (!%p322_p2), 392192  }
   0x8   : > { %1876 = vmatpush3.msra.mxu1 (!%p322_p2), %v455_v3  ;;  %s1999_s27 = smov (!%p322_p2), 80   ;;  %s2000_s28 = smov (!%p322_p2), 88   ;;  %1980 = vset.pattern.permute.xlu0 (!%p322_p2), %v2002_v7  ;;  %vm1151_vm7 = vcmask (!%p322_p2), 523264   ;;  %vm1153_vm8 = vcmask (!%p322_p2), 654336   ;;  %vm1155_vm9 = vcmask (!%p322_p2), 785408   ;;  %vm1157_vm10 = vcmask (!%p322_p2), 916480  }
   0x9   : > { %1885 = vmatprep.subr.mxu1 (!%p322_p2), %v1993_v0  ;;  %s2001_s29 = smov (!%p322_p2), 72   ;;  %s2003_s12 = smov (!%p322_p2), 32  }
   0xa   : > { %s2004_s16 = smov (!%p322_p2), 16   ;;  %s2005_s17 = smov (!%p322_p2), 48  }
   0xb   : > { %s2006_s21 = smov (!%p322_p2), 64   ;;  %s2012_s30 = smov (!%p322_p2), 113  }
   0xc   : > { %s2014_s11 = smov (!%p322_p2), 111  }
   0xd   : > { %s2455_s14 = smov (!%p363_p3, %s1816_s14), 1 }
   0xe   : > { %s1821_s15 = sshll.u32 %s2455_s14, 3 }
   0xf   : > { %s366_s18 = scalar_lea.vmem %s2443_s0, %s1821_s15  ;;  %s371_s20 = scalar_lea.vmem %s2444_s1, %s1821_s15 }
  0x10   : > { %v377_v2 = vld [vmem:[%s366_s18] sm:$0xff] }
  0x11   : > { %1871 = vmatpush3.msra.mxu0 %v377_v2 }
  0x12   : > { %1873 = vmatmul.mubr.msk.f32.vlgmr.msra.gmra.mrb[0].mxu0 %vm381_vm1, %v380_v1  ;;  %1880 = vmatprep.subr.mxu0 %v1993_v0 }
  0x13   : > { %1882 = vmatprep.mubr.msk.f32.mxu0 %vm1994_vm0, %v1993_v0  ;;  %1881 = vmatpush3.msra.mxu0 %v455_v3 }
  0x14   : > { %1890 = vmatprep.subr.mxu0 %v1993_v0 }
  0xe5   : > { %v451_v4 = vpop.f32.mrb[0].mxu0 }
  0xe6   : > { %677 = vrot.lane.b32.xlu1 %v451_v4, %s1995_s23  ;;  %529 = vrot.lane.b32.xlu0 %v451_v4, %s1996_s24  ;;  %v1874_v5 = vpop.f32.mrb[1].mxu0 }
  0xe7   : > { %1878 = vmatmul.mubr.msk.f32.vlgmr.msra.gmra.mrb[0].mxu1 %vm381_vm1, %v451_v4 }
  0xe8   : > { %1886 = vmatpush3.msra.mxu1 %v455_v3  ;;  %1887 = vmatprep.mubr.msk.f32.mxu1 %vm1994_vm0, %v1993_v0 }
  0xe9   : > { %1895 = vmatprep.subr.mxu1 %v1993_v0 }
  0xea   : > { %751 = vrot.lane.b32.xlu1 %v451_v4, %s1997_s25  ;;  %603 = vrot.lane.b32.xlu0 %v451_v4, %s1998_s26 }
  0xee   : > { %899 = vrot.lane.b32.xlu1 %v451_v4, %s1999_s27  ;;  %825 = vrot.lane.b32.xlu0 %v451_v4, %s2000_s28  ;;  %s2010_s28 = smov 1  }
  0xf2   : > { %973 = vrot.lane.b32.xlu0 %v451_v4, %s2001_s29  ;;  %v378_v4 = vld [vmem:[%s371_s20] sm:$0xff]  ;;  %s2011_s29 = smov 127  }
  0xf6   : > { %1168 = vperm.xlu0 %1980, %v2115_v6  }
 0x158   : > { %v678_v8 = vpop.permute.xlu1 %677  ;;  %v530_v9 = vpop.permute.xlu0 %529 }
 0x159   : > { %1883 = vmatmul.mubr.msk.f32.vlgmr.msra.gmra.mrb[2].mxu0 %vm381_vm1, %v530_v9 }
 0x15a   : > { %1891 = vmatpush3.msra.mxu0 %v455_v3  ;;  %1892 = vmatprep.mubr.msk.f32.mxu0 %vm1994_vm0, %v1993_v0 }
 0x15b   : > { %1900 = vmatprep.subr.mxu0 %v1993_v0 }
 0x15c   : > { %v604_v10 = vpop.permute.xlu0 %603  ;;  %v752_v11 = vpop.permute.xlu1 %751 }
 0x15d   : > { %1888 = vmatmul.mubr.msk.f32.vlgmr.msra.gmra.mrb[2].mxu1 %vm381_vm1, %v604_v10  ;;  %1893 = vmatmul.mubr.msk.f32.vlgmr.msra.gmra.mrb[4].mxu0 %vm381_vm1, %v678_v8 }
 0x15e   : > { %1901 = vmatpush3.msra.mxu0 %v455_v3  ;;  %1902 = vmatprep.mubr.msk.f32.mxu0 %vm1994_vm0, %v1993_v0 }
 0x15f   : > { %1896 = vmatpush3.msra.mxu1 %v455_v3  ;;  %1897 = vmatprep.mubr.msk.f32.mxu1 %vm1994_vm0, %v1993_v0 }
 0x160   : > { %v826_v12 = vpop.permute.xlu0 %825  ;;  %1905 = vmatprep.subr.mxu1 %v1993_v0  ;;  %1910 = vmatprep.subr.mxu0 %v1993_v0  ;;  %v900_v13 = vpop.permute.xlu1 %899 }
 0x161   : > { %1898 = vmatmul.mubr.msk.f32.vlgmr.msra.gmra.mrb[4].mxu1 %vm381_vm1, %v752_v11  ;;  %1903 = vmatmul.mubr.msk.f32.vlgmr.msra.gmra.mrb[6].mxu0 %vm381_vm1, %v826_v12  ;;  %v1178_v12 = vcombine.high %v378_v4, %v378_v4 }
 0x162   : > { %1911 = vmatpush3.msra.mxu0 %v455_v3  ;;  %1912 = vmatprep.mubr.msk.f32.mxu0 %vm1994_vm0, %v1993_v0 }
 0x163   : > { %1906 = vmatpush3.msra.mxu1 %v455_v3  ;;  %1907 = vmatprep.mubr.msk.f32.mxu1 %vm1994_vm0, %v1993_v0 }
 0x164   : > { %v974_v14 = vpop.permute.xlu0 %973  ;;  %1835 = vmatprep.subr.msk.mxu1 %vm1183_vm2, %v1178_v12 }
 0x165   : > { %1908 = vmatmul.mubr.msk.f32.vlgmr.msra.gmra.mrb[6].mxu1 %vm381_vm1, %v900_v13  ;;  %1913 = vmatmul.mubr.msk.f32.vlgmr.msra.gmra.mrb[8].mxu0 %vm381_vm1, %v974_v14  ;;  %v1176_v13 = vld [vmem:[%s2448_s5] sm:$0xff]  ;;  %v2007_v14 = vmov 1  }
 0x166   : > { %1252 = vmatprep.mubr.f32.mxu1 %v1993_v0  ;;  %1591 = vmatprep.mubr.f32.mxu0 %v1993_v0 }
 0x167   : > { %1836 = vmatpush1.msk.msra.mxu1 %vm1183_vm2, %v378_v4  ;;  %1981 = vset.pattern.permute.xlu1 %v2007_v14 }
 0x169   : > { %1837 = vmatmul.mubr.msk.f32.vlgmr.msra.gmra.mrb[8].mxu1 %vm1179_vm3, %v1176_v13  ;;  %vm1523_vm3 = vcmask 588800  }
 0x16a   : > { %1326 = vmatprep.mubr.f32.mxu1 %v1993_v0 }
 0x1ba   : > { %v2140_v15 = vpop.f32.mrb[0].mxu1 }
 0x1bb   : > { %v1879_v16 = vpop.f32.mrb[1].mxu1  ;;  %v1047_v17 = vmul.f32 0.5333333, %v2140_v15  ;;  %v1050_v19 = vmul.f32 0.06666666, %v2140_v15 }
 0x1bc   : > { %v1169_v16 = vpop.permute.xlu0 %1168 }
 0x22c   : > { %v599_v18 = vpop.f32.mrb[2].mxu0 }
 0x22d   : > { %v1048_v20 = vmul.f32 0.46666667, %v599_v18  ;;  %v1051_v21 = vmul.f32 0.93333334, %v599_v18  ;;  %v1884_v22 = vpop.f32.mrb[3].mxu0 }
 0x22e   : > { %v1053_v25 = vmul.f32 0.6, %v599_v18  ;;  %v1056_v26 = vmul.f32 0.13333333, %v599_v18 }
 0x22f   : > { %v1052_v23 = vadd.f32 %v1051_v21, %v1050_v19  ;;  %v1049_v24 = vadd.f32 %v1048_v20, %v1047_v17 }
 0x230   : > { %v673_v27 = vpop.f32.mrb[2].mxu1  ;;  %v747_v28 = vpop.f32.mrb[4].mxu0 }
 0x231   : > { %v1054_v29 = vmul.f32 0.4, %v673_v27  ;;  %v1057_v30 = vmul.f32 0.8666667, %v673_v27  ;;  %v1059_v31 = vmul.f32 0.6666666, %v673_v27  ;;  %1094 = vrot.lane.b32.xlu0 %v1052_v23, %s2003_s12  ;;  %1090 = vrot.lane.b32.xlu1 %v1049_v24, %s2004_s16 }
 0x232   : > { %v1062_v32 = vmul.f32 0.19999999, %v673_v27  ;;  %v1060_v33 = vmul.f32 0.33333334, %v747_v28  ;;  %v1063_v34 = vmul.f32 0.8, %v747_v28 }
 0x233   : > { %v1889_v35 = vpop.f32.mrb[3].mxu1  ;;  %v1894_v36 = vpop.f32.mrb[5].mxu0  ;;  %v1055_v37 = vadd.f32 %v1054_v29, %v1053_v25  ;;  %v1058_v38 = vadd.f32 %v1057_v30, %v1056_v26  ;;  %v1065_v39 = vmul.f32 0.73333335, %v747_v28  ;;  %v1068_v40 = vmul.f32 0.26666665, %v747_v28 }
 0x234   : > { %v821_v41 = vpop.f32.mrb[4].mxu1  ;;  %v895_v42 = vpop.f32.mrb[6].mxu0  ;;  %v1061_v43 = vadd.f32 %v1060_v33, %v1059_v31  ;;  %v1064_v44 = vadd.f32 %v1063_v34, %v1062_v32 }
 0x235   : > { %v1066_v45 = vmul.f32 0.26666668, %v821_v41  ;;  %v1069_v46 = vmul.f32 0.73333335, %v821_v41  ;;  %v1071_v47 = vmul.f32 0.8, %v821_v41  ;;  %1098 = vrot.lane.b32.xlu0 %v1055_v37, %s2005_s17 }
 0x236   : > { %v1074_v48 = vmul.f32 0.3333333, %v821_v41  ;;  %v1072_v49 = vmul.f32 0.2, %v895_v42  ;;  %v1075_v50 = vmul.f32 0.6666667, %v895_v42 }
 0x237   : > { %v1899_v51 = vpop.f32.mrb[5].mxu1  ;;  %v1904_v52 = vpop.f32.mrb[7].mxu0  ;;  %v1067_v53 = vadd.f32 %v1066_v45, %v1065_v39  ;;  %v2147_v54 = vadd.f32 %v1069_v46, %v1068_v40  ;;  %v1077_v55 = vmul.f32 0.8666667, %v895_v42  ;;  %v1080_v56 = vmul.f32 0.39999998, %v895_v42 }
 0x238   : > { %v969_v57 = vpop.f32.mrb[6].mxu1  ;;  %v1043_v58 = vpop.f32.mrb[8].mxu0  ;;  %v1073_v59 = vadd.f32 %v1072_v49, %v1071_v47  ;;  %v1076_v60 = vadd.f32 %v1075_v50, %v1074_v48  ;;  %v1175_v48 = vld [vmem:[%s2447_s4] sm:$0xff] }
 0x239   : > { %v1078_v61 = vmul.f32 0.13333334, %v969_v57  ;;  %v1081_v62 = vmul.f32 0.6, %v969_v57  ;;  %v1083_v63 = vmul.f32 0.93333334, %v969_v57  ;;  %1102 = vrot.lane.b32.xlu0 %v1058_v38, %s2006_s21 }
 0x23a   : > { %v1086_v1 = vmul.f32 0.46666664, %v969_v57  ;;  %v1084_v2 = vmul.f32 0.06666667, %v1043_v58  ;;  %v1087_v3 = vmul.f32 0.53333336, %v1043_v58  ;;  %1118 = vrot.lane.b32.xlu1 %v1073_v59, %s2004_s16 }
 0x23b   : > { %v1909_v5 = vpop.f32.mrb[7].mxu1  ;;  %v1914_v7 = vpop.f32.mrb[9].mxu0  ;;  %v1079_v8 = vadd.f32 %v1078_v61, %v1077_v55  ;;  %v1082_v9 = vadd.f32 %v1081_v62, %v1080_v56  ;;  %v1346_v56 = vlaneseq }
 0x23c   : > { %v1085_v10 = vadd.f32 %v1084_v2, %v1083_v63  ;;  %v1088_v11 = vadd.f32 %v1087_v3, %v1086_v1  ;;  %v1839_v63 = vld [vmem:[%s2452_s9 + $0x2] sm:$0x3] }
 0x23d   : > { %1106 = vrot.lane.b32.xlu0 %v1061_v43, %s1999_s27  ;;  %v1354_v57 = vshrl.u32 %v1346_v56, 7 }
 0x23e   : > { %1122 = vrot.lane.b32.xlu1 %v1076_v60, %s2003_s12  ;;  %v1351_v60 = vld [vmem:[%s2452_s9] sm:$0x3] }
 0x23f   : > { %v2216_v59 = vsub.s32 0, %v1354_v57  ;;  %v2221_v61 = vsub.s32 1, %v1354_v57 }
 0x241   : > { %1110 = vrot.lane.b32.xlu0 %v1064_v44, %s1997_s25  ;;  %v2228_v2 = vrot.slane %v1351_v60, %v2216_v59  ;;  %v2231_v3 = vrot.slane %v1351_v60, %v2221_v61  ;;  %v2235_v4 = vrot.slane %v1839_v63, %v2216_v59  ;;  %v2238_v5 = vrot.slane %v1839_v63, %v2221_v61 }
 0x242   : > { %1126 = vrot.lane.b32.xlu1 %v1079_v8, %s2005_s17 }
 0x245   : > { %1114 = vrot.lane.b32.xlu0 %v1067_v53, %s1998_s26 }
 0x246   : > { %1130 = vrot.lane.b32.xlu1 %v1082_v9, %s2006_s21 }
 0x24a   : > { %1134 = vrot.lane.b32.xlu1 %v1085_v10, %s1999_s27  ;;  %s2009_s27 = smov 15  }
 0x24e   : > { %1138 = vrot.lane.b32.xlu1 %v1088_v11, %s1997_s25  ;;  %s2008_s25 = smov 17  }
 0x252   : > { %1142 = vrot.lane.b32.xlu1 %v1043_v58, %s1998_s26  ;;  %v2214_v58 = vand.u32 127, %v1346_v56 }
 0x254   : > { %vm1348_vm11 = vcmp.lt.s32.totalorder %v2214_v58, 17  ;;  %vm1369_vm12 = vcmp.lt.s32.totalorder %v2214_v58, 16  ;;  %vm1391_vm13 = vcmp.lt.s32.totalorder %v2214_v58, 15  ;;  %vm1413_vm14 = vcmp.lt.s32.totalorder %v2214_v58, 1 }
 0x255   : > { %vm1435_vm15 = vcmp.lt.s32.totalorder %v2214_v58, 127  ;;  %vm1457_vm0 = vcmp.lt.s32.totalorder %v2214_v58, 113  ;;  %vm1501_vm2 = vcmp.lt.s32.totalorder %v2214_v58, 111 }
 0x256   : > { %1334 = vperm.xlu1 %1981, %v2115_v6  }
 0x2a3   : > { %v1095_v17 = vpop.permute.xlu0 %1094  ;;  %v1091_v19 = vpop.permute.xlu1 %1090 }
 0x2a4   : > { %v1146_v27 = vsel %vm1145_vm4, %v2140_v15, %v1091_v19 }
 0x2a5   : > { %v1148_v29 = vsel %vm1147_vm5, %v1146_v27, %v1095_v17 }
 0x2a7   : > { %v1099_v18 = vpop.permute.xlu0 %1098 }
 0x2a8   : > { %v1150_v30 = vsel %vm1149_vm6, %v1148_v29, %v1099_v18  ;;  %v1840_v18 = vld [vmem:[%s2452_s9 + $0x4] sm:$0x3] }
 0x2ab   : > { %v1103_v21 = vpop.permute.xlu0 %1102 }
 0x2ac   : > { %v1119_v20 = vpop.permute.xlu1 %1118  ;;  %v1152_v31 = vsel %vm1151_vm7, %v1150_v30, %v1103_v21 }
 0x2ad   : > { %v1159_v32 = vsel %vm1145_vm4, %v2147_v54, %v1119_v20  ;;  %v1841_v20 = vld [vmem:[%s2452_s9 + $0x6] sm:$0x3] }
 0x2ae   : > { %v2270_v27 = vrot.slane %v1841_v20, %v2221_v61 }
 0x2af   : > { %v1107_v23 = vpop.permute.xlu0 %1106 }
 0x2b0   : > { %v1123_v22 = vpop.permute.xlu1 %1122  ;;  %v1154_v34 = vsel %vm1153_vm8, %v1152_v31, %v1107_v23 }
 0x2b1   : > { %v1160_v35 = vsel %vm1147_vm5, %v1159_v32, %v1123_v22 }
 0x2b3   : > { %v1111_v26 = vpop.permute.xlu0 %1110 }
 0x2b4   : > { %v1127_v24 = vpop.permute.xlu1 %1126  ;;  %v1156_v37 = vsel %vm1155_vm9, %v1154_v34, %v1111_v26  ;;  %v2267_v26 = vrot.slane %v1841_v20, %v2216_v59 }
 0x2b5   : > { %v1161_v38 = vsel %vm1149_vm6, %v1160_v35, %v1127_v24  ;;  %v2260_v24 = vrot.slane %v1840_v18, %v2216_v59 }
 0x2b7   : > { %v1115_v33 = vpop.permute.xlu0 %1114 }
 0x2b8   : > { %v1131_v25 = vpop.permute.xlu1 %1130  ;;  %v1158_v15 = vsel %vm1157_vm10, %v1156_v37, %v1115_v33 }
 0x2b9   : > { %v1162_v39 = vsel %vm1151_vm7, %v1161_v38, %v1131_v25  ;;  %v1171_v43 = vadd.f32 %v1169_v16, %v1158_v15  ;;  %v2263_v25 = vrot.slane %v1840_v18, %v2221_v61 }
 0x2bb   : > { %v1173_v47 = vmax.f32 %v1171_v43, 0.0 }
 0x2bc   : > { %v1135_v28 = vpop.permute.xlu1 %1134 }
 0x2bd   : > { %v1163_v40 = vsel %vm1153_vm8, %v1162_v39, %v1135_v28  ;;  %v1842_v28 = vld [vmem:[%s2452_s9 + $0xa] sm:$0x3] }
 0x2be   : > { %v2285_v35 = vrot.slane %v1842_v28, %v2216_v59 }
 0x2c0   : > { %v1139_v36 = vpop.permute.xlu1 %1138 }
 0x2c1   : > { %v1164_v41 = vsel %vm1155_vm9, %v1163_v40, %v1139_v36  ;;  %v2288_v36 = vrot.slane %v1842_v28, %v2221_v61 }
 0x2c4   : > { %v1143_v42 = vpop.permute.xlu1 %1142 }
 0x2c5   : > { %v1165_v44 = vsel %vm1157_vm10, %v1164_v41, %v1143_v42 }
 0x2c6   : > { %v1172_v45 = vadd.f32 %v1169_v16, %v1165_v44 }
 0x2c8   : > { %v1174_v46 = vmax.f32 %v1172_v45, 0.0 }
 0x2ca   : > { %1262 = vmatprep.subr.mxu1 %v1174_v46 }
 0x2cb   : > { %1263 = vmatpush1.msra.mxu1 %v1173_v47 }
 0x2cc   : > { %1838 = vmatmul.mubr.msk.f32.vlgmr.msra.gmra.mrb[8].mxu1 %vm381_vm1, %v1175_v48  ;;  %v1843_v48 = vld [vmem:[%s2452_s9 + $0xc] sm:$0x3]  ;;  %vm1479_vm1 = vcmp.lt.s32.totalorder %v2214_v58, 112 }
 0x2cd   : > { %1736 = vmatprep.mubr.f32.mxu1 %v1993_v0  ;;  %v2013_v0 = vmov 2   ;;  %v2313_v56 = vrot.slane %v1843_v48, %v2221_v61 }
 0x2ce   : > { %1982 = vset.pattern.permute.xlu0 %v2013_v0  ;;  %v2310_v0 = vrot.slane %v1843_v48, %v2216_v59 }
 0x2d5   : > { %v1335_v49 = vpop.permute.xlu1 %1334 }
 0x39f   : > { %v1328_v50 = vpop.f32.mrb[8].mxu1 }
 0x3a0   : > { %v1337_v51 = vadd.f32 %v1335_v49, %v1328_v50  ;;  %v1330_v52 = vpop.f32.mrb[9].mxu1  ;;  %v1844_v50 = vld [vmem:[%s2452_s9 + $0xe] sm:$0x3] }
 0x3a1   : > { %v1338_v53 = vadd.f32 %v1335_v49, %v1330_v52  ;;  %v2317_v57 = vrot.slane %v1844_v50, %v2216_v59  ;;  %v2320_v60 = vrot.slane %v1844_v50, %v2221_v61 }
 0x3a2   : > { %v2177_v54 = vmax.f32 %v1337_v51, 0.0 }
 0x3a3   : > { %v2179_v55 = vmax.f32 %v1338_v53, 0.0 }
 0x3a4   : > { %1342 = vrot.lane.b32.xlu0 %v2177_v54, %s2008_s25 }
 0x3a5   : > { %1344 = vrot.lane.b32.xlu1 %v2179_v55, %s2008_s25 }
 0x3a8   : > { %1365 = vrot.lane.b32.xlu0 %v2177_v54, %s2004_s16 }
 0x3a9   : > { %1367 = vrot.lane.b32.xlu1 %v2179_v55, %s2004_s16 }
 0x3ac   : > { %1387 = vrot.lane.b32.xlu0 %v2177_v54, %s2009_s27 }
 0x3ad   : > { %1389 = vrot.lane.b32.xlu1 %v2179_v55, %s2009_s27 }
 0x3b0   : > { %1409 = vrot.lane.b32.xlu0 %v2177_v54, %s2010_s28 }
 0x3b1   : > { %1411 = vrot.lane.b32.xlu1 %v2179_v55, %s2010_s28 }
 0x3b4   : > { %1431 = vrot.lane.b32.xlu0 %v2177_v54, %s2011_s29 }
 0x3b5   : > { %1433 = vrot.lane.b32.xlu1 %v2179_v55, %s2011_s29 }
 0x3b8   : > { %1453 = vrot.lane.b32.xlu0 %v2177_v54, %s2012_s30 }
 0x3b9   : > { %1455 = vrot.lane.b32.xlu1 %v2179_v55, %s2012_s30 }
 0x3bc   : > { %1475 = vrot.lane.b32.xlu0 %v2177_v54, %s1998_s26 }
 0x3bd   : > { %1477 = vrot.lane.b32.xlu1 %v2179_v55, %s1998_s26 }
 0x3c0   : > { %1497 = vrot.lane.b32.xlu0 %v2177_v54, %s2014_s11 }
 0x3c1   : > { %1499 = vrot.lane.b32.xlu1 %v2179_v55, %s2014_s11 }
 0x3c4   : > { %1520 = vperm.xlu0 %1982, %v2115_v6  }
 0x416   : > { %v1343_v62 = vpop.permute.xlu0 %1342 }
 0x417   : > { %v1345_v1 = vpop.permute.xlu1 %1344 }
 0x418   : > { %v1349_v7 = vsel %vm1348_vm11, %v1343_v62, %v1345_v1  ;;  %v1350_v8 = vsel %vm1348_vm11, %v1345_v1, %v1343_v62  ;;  %v1845_v62 = vld [vmem:[%s2452_s9 + $0x10] sm:$0x3] }
 0x419   : > { %v1363_v13 = vmul.f32 %v2228_v2, %v1350_v8  ;;  %v1364_v14 = vmul.f32 %v2231_v3, %v1349_v7 }
 0x41a   : > { %v1366_v9 = vpop.permute.xlu0 %1365 }
 0x41b   : > { %v1368_v10 = vpop.permute.xlu1 %1367 }
 0x41c   : > { %v1370_v11 = vsel %vm1369_vm12, %v1366_v9, %v1368_v10  ;;  %v1371_v12 = vsel %vm1369_vm12, %v1368_v10, %v1366_v9 }
 0x41d   : > { %v1385_v16 = vmul.f32 %v2235_v4, %v1371_v12  ;;  %v1386_v17 = vmul.f32 %v2238_v5, %v1370_v11  ;;  %v2335_v11 = vrot.slane %v1845_v62, %v2221_v61 }
 0x41e   : > { %v1388_v19 = vpop.permute.xlu0 %1387 }
 0x41f   : > { %v1917_v21 = vpack.c.bf16 %v1385_v16, %v1363_v13  ;;  %v1390_v22 = vpop.permute.xlu1 %1389  ;;  %v1915_v23 = vpack.c.bf16 %v1386_v17, %v1364_v14 }
 0x420   : > { %v1392_v29 = vsel %vm1391_vm13, %v1388_v19, %v1390_v22  ;;  %v1393_v30 = vsel %vm1391_vm13, %v1390_v22, %v1388_v19 }
 0x421   : > { %1916 = vmatprep.subr.bf16.mxu0 %v1915_v23  ;;  %v1407_v37 = vmul.f32 %v2260_v24, %v1393_v30  ;;  %v1408_v38 = vmul.f32 %v2263_v25, %v1392_v29  ;;  %v1341_v29 = vld [vmem:[%s2449_s6] sm:$0xff] }
 0x422   : > { %1918 = vmatpush1.bf16.msra.mxu0 %v1917_v21  ;;  %v1410_v31 = vpop.permute.xlu0 %1409  ;;  %v2342_v21 = vrot.slane %v1845_v62, %v2216_v59 }
 0x423   : > { %v1412_v32 = vpop.permute.xlu1 %1411 }
 0x424   : > { %v1414_v33 = vsel %vm1413_vm14, %v1410_v31, %v1412_v32  ;;  %v1415_v34 = vsel %vm1413_vm14, %v1412_v32, %v1410_v31 }
 0x425   : > { %v1429_v15 = vmul.f32 %v2267_v26, %v1415_v34  ;;  %v1430_v39 = vmul.f32 %v2270_v27, %v1414_v33 }
 0x426   : > { %v1432_v40 = vpop.permute.xlu0 %1431 }
 0x427   : > { %v1921_v41 = vpack.c.bf16 %v1429_v15, %v1407_v37  ;;  %v1434_v42 = vpop.permute.xlu1 %1433  ;;  %v1919_v43 = vpack.c.bf16 %v1430_v39, %v1408_v38  ;;  %v2015_v38 = vmov 3  }
 0x428   : > { %v1436_v44 = vsel %vm1435_vm15, %v1432_v40, %v1434_v42  ;;  %v1437_v45 = vsel %vm1435_vm15, %v1434_v42, %v1432_v40  ;;  %1983 = vset.pattern.permute.xlu0 %v2015_v38 }
 0x429   : > { %v1451_v46 = vmul.f32 %v2285_v35, %v1436_v44  ;;  %v1452_v47 = vmul.f32 %v2288_v36, %v1437_v45  ;;  %1920 = vmatprep.subr.bf16.mxu0 %v1919_v43 }
 0x42a   : > { %1922 = vmatpush1.bf16.msra.mxu0 %v1921_v41  ;;  %v1454_v49 = vpop.permute.xlu0 %1453 }
 0x42b   : > { %v1925_v51 = vpack.c.bf16 %v1451_v46, %v2177_v54  ;;  %v1456_v52 = vpop.permute.xlu1 %1455  ;;  %v1923_v53 = vpack.c.bf16 %v1452_v47, %v2179_v55 }
 0x42c   : > { %v1458_v63 = vsel %vm1457_vm0, %v1454_v49, %v1456_v52  ;;  %v1459_v1 = vsel %vm1457_vm0, %v1456_v52, %v1454_v49 }
 0x42d   : > { %1924 = vmatprep.subr.bf16.mxu0 %v1923_v53  ;;  %v1473_v12 = vmul.f32 %v2310_v0, %v1458_v63  ;;  %v1474_v13 = vmul.f32 %v2313_v56, %v1459_v1 }
 0x42e   : > { %1926 = vmatpush1.bf16.msra.mxu0 %v1925_v51  ;;  %v1476_v7 = vpop.permute.xlu0 %1475 }
 0x42f   : > { %v1478_v8 = vpop.permute.xlu1 %1477 }
 0x430   : > { %v1480_v9 = vsel %vm1479_vm1, %v1476_v7, %v1478_v8  ;;  %v1481_v10 = vsel %vm1479_vm1, %v1478_v8, %v1476_v7 }
 0x431   : > { %v1495_v14 = vmul.f32 %v2317_v57, %v1480_v9  ;;  %v1496_v16 = vmul.f32 %v2320_v60, %v1481_v10 }
 0x432   : > { %v1498_v17 = vpop.permute.xlu0 %1497 }
 0x433   : > { %v1929_v18 = vpack.c.bf16 %v1495_v14, %v1473_v12  ;;  %v1500_v19 = vpop.permute.xlu1 %1499  ;;  %v1927_v20 = vpack.c.bf16 %v1496_v16, %v1474_v13 }
 0x434   : > { %v1503_v22 = vsel %vm1501_vm2, %v1500_v19, %v1498_v17  ;;  %v1502_v61 = vsel %vm1501_vm2, %v1498_v17, %v1500_v19 }
 0x435   : > { %v1518_v23 = vmul.f32 %v2335_v11, %v1503_v22  ;;  %1928 = vmatprep.subr.bf16.mxu0 %v1927_v20  ;;  %v1517_v28 = vmul.f32 %v2342_v21, %v1502_v61 }
 0x436   : > { %1930 = vmatpush1.bf16.msra.mxu0 %v1929_v18 }
 0x437   : > { %1543 = vmatprep.subr.mxu0 %v1518_v23 }
 0x43a   : > { %1544 = vmatpush1.msra.mxu0 %v1517_v28 }
 0x43b   : > { %1846 = vmatmul.mubr.msk.f32.vlgmr.msra.gmra.mrb[10].mxu0 %vm1523_vm3, %v1341_v29 }
 0x443   : > { %v1521_v59 = vpop.permute.xlu0 %1520 }
 0x50e   : > { %v1593_v30 = vpop.f32.mrb[10].mxu0 }
 0x50f   : > { %v1594_v31 = vadd.f32 %v1593_v30, %v1521_v59  ;;  %v1595_v32 = vpop.f32.mrb[11].mxu0 }
 0x510   : > { %v1596_v34 = vadd.f32 %v1595_v32, %v1521_v59 }
 0x511   : > { %v2354_v33 = vmax.f32 %v1594_v31, 0.0 }
 0x512   : > { %v1599_v37 = vmax.f32 %v1596_v34, 0.0 }
 0x513   : > { %1609 = vrot.lane.b32.xlu0 %v2354_v33, %s2004_s16  ;;  %1601 = vrot.lane.b32.xlu1 %v2354_v33, %s2008_s25 }
 0x517   : > { %1617 = vrot.lane.b32.xlu0 %v2354_v33, %s2009_s27  ;;  %1603 = vrot.lane.b32.xlu1 %v1599_v37, %s2008_s25  ;;  %s1851_s25 = sshll.u32 %s2455_s14, 4 }
 0x51b   : > { %1625 = vrot.lane.b32.xlu0 %v2354_v33, %s2010_s28  ;;  %1611 = vrot.lane.b32.xlu1 %v1599_v37, %s2004_s16 }
 0x51f   : > { %1633 = vrot.lane.b32.xlu0 %v2354_v33, %s2011_s29  ;;  %1619 = vrot.lane.b32.xlu1 %v1599_v37, %s2009_s27 }
 0x523   : > { %1641 = vrot.lane.b32.xlu0 %v2354_v33, %s2012_s30  ;;  %1627 = vrot.lane.b32.xlu1 %v1599_v37, %s2010_s28 }
 0x527   : > { %1649 = vrot.lane.b32.xlu0 %v2354_v33, %s1998_s26  ;;  %1635 = vrot.lane.b32.xlu1 %v1599_v37, %s2011_s29  ;;  %s376_s29 = scalar_lea.vmem %s2453_s10, %s1851_s25 }
 0x52b   : > { %1657 = vrot.lane.b32.xlu0 %v2354_v33, %s2014_s11  ;;  %1643 = vrot.lane.b32.xlu1 %v1599_v37, %s2012_s30 }
 0x52f   : > { %1651 = vrot.lane.b32.xlu1 %v1599_v37, %s1998_s26  ;;  %1666 = vperm.xlu0 %1983, %v2115_v6  }
 0x533   : > { %1659 = vrot.lane.b32.xlu1 %v1599_v37, %s2014_s11 }
 0x585   : > { %v1610_v15 = vpop.permute.xlu0 %1609  ;;  %v1602_v39 = vpop.permute.xlu1 %1601 }
 0x589   : > { %v1618_v40 = vpop.permute.xlu0 %1617  ;;  %v1604_v41 = vpop.permute.xlu1 %1603 }
 0x58a   : > { %v1605_v42 = vsel %vm1348_vm11, %v1602_v39, %v1604_v41  ;;  %v1606_v43 = vsel %vm1348_vm11, %v1604_v41, %v1602_v39 }
 0x58b   : > { %v1607_v47 = vmul.f32 %v1606_v43, %v2228_v2  ;;  %v1608_v48 = vmul.f32 %v1605_v42, %v2231_v3 }
 0x58d   : > { %v1626_v44 = vpop.permute.xlu0 %1625  ;;  %v1612_v45 = vpop.permute.xlu1 %1611 }
 0x58e   : > { %v1613_v46 = vsel %vm1369_vm12, %v1610_v15, %v1612_v45  ;;  %v1614_v6 = vsel %vm1369_vm12, %v1612_v45, %v1610_v15 }
 0x58f   : > { %v1615_v49 = vmul.f32 %v1614_v6, %v2235_v4  ;;  %v1616_v50 = vmul.f32 %v1613_v46, %v2238_v5 }
 0x591   : > { %v1933_v51 = vpack.c.bf16 %v1615_v49, %v1607_v47  ;;  %v1620_v52 = vpop.permute.xlu1 %1619  ;;  %v1931_v53 = vpack.c.bf16 %v1616_v50, %v1608_v48  ;;  %v1634_v62 = vpop.permute.xlu0 %1633 }
 0x592   : > { %v1621_v63 = vsel %vm1391_vm13, %v1618_v40, %v1620_v52  ;;  %v1622_v1 = vsel %vm1391_vm13, %v1620_v52, %v1618_v40 }
 0x593   : > { %1932 = vmatprep.subr.bf16.mxu1 %v1931_v53  ;;  %v1623_v4 = vmul.f32 %v1622_v1, %v2260_v24  ;;  %v1624_v5 = vmul.f32 %v1621_v63, %v2263_v25 }
 0x594   : > { %1934 = vmatpush1.bf16.msra.mxu1 %v1933_v51 }
 0x595   : > { %v1628_v7 = vpop.permute.xlu1 %1627  ;;  %v1642_v10 = vpop.permute.xlu0 %1641 }
 0x596   : > { %v1629_v2 = vsel %vm1413_vm14, %v1626_v44, %v1628_v7  ;;  %v1630_v3 = vsel %vm1413_vm14, %v1628_v7, %v1626_v44 }
 0x597   : > { %v1631_v8 = vmul.f32 %v1630_v3, %v2267_v26  ;;  %v1632_v9 = vmul.f32 %v1629_v2, %v2270_v27 }
 0x599   : > { %v1937_v12 = vpack.c.bf16 %v1631_v8, %v1623_v4  ;;  %v1636_v13 = vpop.permute.xlu1 %1635  ;;  %v1935_v14 = vpack.c.bf16 %v1632_v9, %v1624_v5  ;;  %v1650_v19 = vpop.permute.xlu0 %1649 }
 0x59a   : > { %v1637_v16 = vsel %vm1435_vm15, %v1634_v62, %v1636_v13  ;;  %v1638_v17 = vsel %vm1435_vm15, %v1636_v13, %v1634_v62 }
 0x59b   : > { %v1639_v18 = vmul.f32 %v1637_v16, %v2285_v35  ;;  %v1640_v24 = vmul.f32 %v1638_v17, %v2288_v36  ;;  %1936 = vmatprep.subr.bf16.mxu1 %v1935_v14 }
 0x59c   : > { %1938 = vmatpush1.bf16.msra.mxu1 %v1937_v12 }
 0x59d   : > { %v1941_v25 = vpack.c.bf16 %v1639_v18, %v2354_v33  ;;  %v1644_v26 = vpop.permute.xlu1 %1643  ;;  %v1939_v27 = vpack.c.bf16 %v1640_v24, %v1599_v37  ;;  %v1658_v30 = vpop.permute.xlu0 %1657 }
 0x59e   : > { %v1645_v20 = vsel %vm1457_vm0, %v1642_v10, %v1644_v26  ;;  %v1646_v22 = vsel %vm1457_vm0, %v1644_v26, %v1642_v10 }
 0x59f   : > { %1940 = vmatprep.subr.bf16.mxu1 %v1939_v27  ;;  %v1647_v23 = vmul.f32 %v1645_v20, %v2310_v0  ;;  %v1648_v28 = vmul.f32 %v1646_v22, %v2313_v56  ;;  %v1600_v56 = vld [vmem:[%s2450_s7] sm:$0xff] }
 0x5a0   : > { %1942 = vmatpush1.bf16.msra.mxu1 %v1941_v25 }
 0x5a1   : > { %v1652_v61 = vpop.permute.xlu1 %1651 }
 0x5a2   : > { %v1653_v35 = vsel %vm1479_vm1, %v1650_v19, %v1652_v61  ;;  %v1654_v36 = vsel %vm1479_vm1, %v1652_v61, %v1650_v19 }
 0x5a3   : > { %v1655_v29 = vmul.f32 %v1653_v35, %v2317_v57  ;;  %v1656_v59 = vmul.f32 %v1654_v36, %v2320_v60 }
 0x5a5   : > { %v1945_v31 = vpack.c.bf16 %v1655_v29, %v1647_v23  ;;  %v1660_v32 = vpop.permute.xlu1 %1659  ;;  %v1943_v33 = vpack.c.bf16 %v1656_v59, %v1648_v28 }
 0x5a6   : > { %v1662_v34 = vsel %vm1501_vm2, %v1660_v32, %v1658_v30  ;;  %v1661_v37 = vsel %vm1501_vm2, %v1658_v30, %v1660_v32 }
 0x5a7   : > { %v1664_v38 = vmul.f32 %v1662_v34, %v2335_v11  ;;  %1944 = vmatprep.subr.bf16.mxu1 %v1943_v33  ;;  %v1663_v0 = vmul.f32 %v1661_v37, %v2342_v21 }
 0x5a8   : > { %1946 = vmatpush1.bf16.msra.mxu1 %v1945_v31 }
 0x5a9   : > { %1688 = vmatprep.subr.mxu1 %v1664_v38 }
 0x5ac   : > { %1689 = vmatpush1.msra.mxu1 %v1663_v0 }
 0x5ad   : > { %1847 = vmatmul.mubr.msk.f32.vlgmr.msra.gmra.mrb[10].mxu1 %vm1523_vm3, %v1600_v56 }
 0x5ae   : > { %v1667_v57 = vpop.permute.xlu0 %1666 }
 0x680   : > { %v1738_v60 = vpop.f32.mrb[10].mxu1 }
 0x681   : > { %v1739_v15 = vadd.f32 %v1738_v60, %v1667_v57  ;;  %v1740_v58 = vpop.f32.mrb[11].mxu1 }
 0x682   : > { %v1741_v39 = vadd.f32 %v1740_v58, %v1667_v57 }
 0x683   : > { %v1743_v11 = vadd.f32 %v1739_v15, %v2177_v54 }
 0x684   : > { %v1744_v21 = vadd.f32 %v1741_v39, %v2179_v55 }
 0x685   : > { %v1745_v40 = vmax.f32 %v1743_v11, 0.0 }
 0x686   : > { %v1746_v41 = vmax.f32 %v1744_v21, 0.0 }
 0x687   : > { %1747 = vst [vmem:[%s376_s29] sm:$0xff] %v1745_v40 }
 0x688   : > { %1748 = vst [vmem:[%s376_s29 + $0x8] sm:$0xff] %v1746_v41 }
 0x689 PF: > { %s20_s13 = sadd.s32 1, %s1991_s13  }
 0x68a   : > { %p17_p4 = scmp.ge.s32.totalorder %s20_s13, 4  }
 0x68c   :  { %19 = sbr.rel (!%p17_p4) target bundleno = 1 (0x1), region = 100 }

</bundles_post_ra>
